<compile_context>
chip_gen: v5e
topology: v5e:2x2
jax: 0.10.0
libtpu: 0.0.40
codegen_flags: <defaults>
</compile_context>

<pallas_src>
import jax
import jax.numpy as jnp
from jax import lax
from jax.experimental import pallas as pl
from jax.experimental.pallas import tpu as pltpu

LANE = 128
SUBLANE = 8
MAX_BLOCK_ROWS = 8192          # (8192, 128) f32 = 4 MiB per input block
CHUNK_ROWS = 512               # in-kernel strip-mine; temporaries <= 256 KiB
MIN_PALLAS_ROWS = 256          # below this (32K elems) fused jnp reduce wins
MIN_SPLIT_ROWS = 512           # need >= this many rows to split across 2 TCs
TC_SPLIT = 2                   # v7x has 2 TensorCores; harmless elsewhere
VMEM_LIMIT_BYTES = 32 * 1024 * 1024


def _cdiv(a, b):
    return -(-a // b)


def _round_up(x, m):
    return _cdiv(x, m) * m


def _row_granularity(dtype):
    """Second-minor tile multiple for this dtype (sub-32-bit packs sublanes)."""
    itemsize = jnp.dtype(dtype).itemsize
    return SUBLANE * max(1, 4 // max(1, itemsize))


def _make_wsse_kernel(block_rows, steps, rows_valid, w_even, w_odd):
    """Weighted-SSE kernel; all sizing / weights baked in as Python constants."""
    n_full = block_rows // CHUNK_ROWS
    rem = block_rows - n_full * CHUNK_ROWS   # multiple of the sublane granularity

    def kernel(a_ref, b_ref, o_ref, acc_ref):
        c = pl.program_id(0)      # TensorCore split axis ("parallel")
        i = pl.program_id(1)      # streaming reduction axis ("arbitrary")

        @pl.when(i == 0)
        def _init():
            acc_ref[...] = jnp.zeros_like(acc_ref)

        # Logical (unclamped) first row of this block; used for the tail mask.
        row0 = (c * steps + i) * block_rows

        def partial_sum(start, nrows):
            # `start` may be traced, `nrows` is a static int (multiple of 8).
            a = a_ref[pl.ds(start, nrows), :].astype(jnp.float32)
            b = b_ref[pl.ds(start, nrows), :].astype(jnp.float32)
            d = a - b
            sq = d * d
            rid = row0 + start + lax.broadcasted_iota(jnp.int32, (nrows, LANE), 0)
            sq = jnp.where(rid < rows_valid, sq, 0.0)
            # Fold groups of 8 rows into (8,128): pure full-vreg VPU adds.
            return jnp.sum(sq.reshape(nrows // SUBLANE, SUBLANE, LANE), axis=0)

        acc = acc_ref[...]
        if n_full == 1:
            acc = acc + partial_sum(0, CHUNK_ROWS)
        elif n_full > 1:
            def body(j, carry):
                start = pl.multiple_of(j * CHUNK_ROWS, CHUNK_ROWS)
                return carry + partial_sum(start, CHUNK_ROWS)
            acc = lax.fori_loop(0, n_full, body, acc)
        if rem > 0:
            acc = acc + partial_sum(n_full * CHUNK_ROWS, rem)
        acc_ref[...] = acc

        @pl.when(i == steps - 1)
        def _fini():
            # Even lanes carry x (weight w_even), odd lanes carry y (w_odd).
            lane_par = lax.broadcasted_iota(jnp.int32, (SUBLANE, LANE), 1) % 2
            w = jnp.where(lane_par == 0, jnp.float32(w_even), jnp.float32(w_odd))
            o_ref[...] = (acc_ref[...] * w).reshape(1, SUBLANE, LANE)

    return kernel


def _weighted_sse_pallas(a2, b2, w_even, w_odd, num_cores):
    """Pallas launch over a (rows, 128) pair; returns the weighted SSE scalar."""
    rows = a2.shape[0]
    gran = max(_row_granularity(a2.dtype), _row_granularity(b2.dtype))
    rows_per_core = _cdiv(rows, num_cores)
    steps = _cdiv(rows_per_core, MAX_BLOCK_ROWS)
    block_rows = _round_up(_cdiv(rows_per_core, steps), gran)   # <= MAX_BLOCK_ROWS
    last_block = _cdiv(rows, block_rows) - 1                    # last in-bounds block

    def in_map(c, i):
        # Clamp so no DMA ever starts past the array; redundant / partial rows
        # are zeroed by the in-kernel row mask.
        return (jnp.minimum(c * steps + i, last_block), 0)

    kernel = _make_wsse_kernel(block_rows, steps, rows, w_even, w_odd)

    out = pl.pallas_call(
        kernel,
        out_shape=jax.ShapeDtypeStruct((num_cores, SUBLANE, LANE), jnp.float32),
        grid_spec=pltpu.PrefetchScalarGridSpec(
            num_scalar_prefetch=0,
            grid=(num_cores, steps),
            in_specs=[
                pl.BlockSpec((block_rows, LANE), in_map),
                pl.BlockSpec((block_rows, LANE), in_map),
            ],
            out_specs=pl.BlockSpec((1, SUBLANE, LANE), lambda c, i: (c, 0, 0)),
            scratch_shapes=[pltpu.VMEM((SUBLANE, LANE), jnp.float32)],
        ),
        compiler_params=pltpu.CompilerParams(
            dimension_semantics=("parallel", "arbitrary"),
            vmem_limit_bytes=VMEM_LIMIT_BYTES,
        ),
    )(a2, b2)
    # (num_cores, 8, 128) per-core/sublane/lane partials -> scalar (tiny).
    return jnp.sum(out)


def _jnp_weighted_sse(a, b, w_even, w_odd):
    """Fused-XLA fallback; assumes the flat slice starts at an even index."""
    d = a.astype(jnp.float32) - b.astype(jnp.float32)
    if w_even == w_odd:
        return jnp.float32(w_even) * jnp.sum(d * d)
    par = (jnp.arange(d.shape[0], dtype=jnp.int32) % 2) == 0
    w = jnp.where(par, jnp.float32(w_even), jnp.float32(w_odd))
    return jnp.sum(w * d * d)


def _weighted_sse(a, b, w_even, w_odd):
    """sum_i w_{i % 2} * (a_i - b_i)^2 over the flattened inputs (f32 accumulate)."""
    a = a.reshape(-1)
    b = b.reshape(-1)
    n = a.shape[0]
    rows = n // LANE

    if rows < MIN_PALLAS_ROWS:
        # Launch-bound regime: a single fused XLA reduction beats a Pallas call.
        return _jnp_weighted_sse(a, b, w_even, w_odd)

    n_main = rows * LANE
    num_cores = TC_SPLIT if rows >= MIN_SPLIT_ROWS else 1
    a2 = a[:n_main].reshape(rows, LANE)
    b2 = b[:n_main].reshape(rows, LANE)
    total = _weighted_sse_pallas(a2, b2, w_even, w_odd, num_cores)
    if n_main < n:
        # Sub-128 ragged tail (< one vreg row); n_main is even so parity holds.
        total = total + _jnp_weighted_sse(a[n_main:], b[n_main:], w_even, w_odd)
    return total


class MC_NeRF_Loss:
    """JAX/Pallas port of the PyTorch MC_NeRF_Loss module (forward only)."""

    def __init__(self, sys_param, tblogger=None):
        self.sys_param = sys_param
        self.tblogger = tblogger
        self.global_step = 0
        self.img_h = self.sys_param['data_img_h']
        self.img_w = self.sys_param['data_img_w']

    def __call__(self, loss_dict, epoch_type):
        final_loss = jnp.float32(0.0)
        self.global_step += 1
        if 'intr' in loss_dict:
            loss_intr = self.get_reproject_loss(loss_dict['intr'])
            if epoch_type == 'CAM_PARAM_EPOCH':
                final_loss = final_loss + loss_intr
            else:
                # loss_intr / (loss_intr.detach() + 1e-8)
                final_loss = final_loss + loss_intr / (
                    lax.stop_gradient(loss_intr) + 1e-08)
        if 'extr' in loss_dict:
            final_loss = final_loss + self.get_reproject_loss(loss_dict['extr'])
        if 'rgb' in loss_dict:
            final_loss = final_loss + self.get_rgb_loss(loss_dict['rgb'])
        return final_loss

    def get_rgb_loss(self, rgbs_list):
        rgbs_c, rgbs_f, rgbs_gt = rgbs_list[0], rgbs_list[1], rgbs_list[2]
        n = rgbs_gt.size
        loss_rgb_c = _weighted_sse(rgbs_c, rgbs_gt, 1.0, 1.0) / jnp.float32(n)
        if rgbs_f is None:
            loss_rgb_f = jnp.float32(0.0)
        else:
            loss_rgb_f = _weighted_sse(rgbs_f, rgbs_gt, 1.0, 1.0) / jnp.float32(n)
        return loss_rgb_c + loss_rgb_f

    def get_reproject_loss(self, rpro_list):
        pd_pts, gt_pts = rpro_list[0], rpro_list[1]
        # The lane-parity weighting relies on a contiguous trailing dim of 2.
        assert pd_pts.shape[-1] == 2 and gt_pts.shape[-1] == 2
        # MSE(pd_x/W, gt_x/W) + MSE(pd_y/H, gt_y/H)
        #   == ( sum_x dx^2 / W^2 + sum_y dy^2 / H^2 ) / num_points
        # x sits on even flat indices (even lanes), y on odd -> one fused pass
        # with per-lane weights; /W, /H hoisted into the weights.
        num_pts = pd_pts.size // 2
        w_even = 1.0 / float(self.img_w * self.img_w)   # x weight
        w_odd = 1.0 / float(self.img_h * self.img_h)    # y weight
        sse = _weighted_sse(pd_pts, gt_pts, w_even, w_odd)
        return sse / jnp.float32(num_pts)


def _reference_loss(loss_dict, epoch_type, img_h, img_w):
    """Pure-jnp reference (direct port of the PyTorch forward)."""
    def mse(a, b):
        return jnp.mean((a.astype(jnp.float32) - b.astype(jnp.float32)) ** 2)

    final = jnp.float32(0.0)
    if 'intr' in loss_dict:
        pd, gt = loss_dict['intr']
        li = mse(pd[..., 0] / img_w, gt[..., 0] / img_w) + \
             mse(pd[..., 1] / img_h, gt[..., 1] / img_h)
        if epoch_type == 'CAM_PARAM_EPOCH':
            final = final + li
        else:
            final = final + li / (lax.stop_gradient(li) + 1e-08)
    if 'extr' in loss_dict:
        pd, gt = loss_dict['extr']
        final = final + mse(pd[..., 0] / img_w, gt[..., 0] / img_w) + \
                mse(pd[..., 1] / img_h, gt[..., 1] / img_h)
    if 'rgb' in loss_dict:
        c, f, g = loss_dict['rgb']
        final = final + mse(c, g) + (0.0 if f is None else mse(f, g))
    return final


if __name__ == "__main__":
    key = jax.random.PRNGKey(0)
    k1, k2, k3, k4, k5, k6, k7 = jax.random.split(key, 7)

    img_h, img_w = 24, 32          # distinct H/W to exercise the x/y weighting
    sys_param = {'data_img_h': img_h, 'data_img_w': img_w}

    n_cam, n_pts = 8, 100          # reprojection points: small -> fused-JAX path
    n_rays = 90000                 # rgb: exercises the Pallas streaming path
                                   # (2-way grid split, chunked inner loop,
                                   #  masked partial block, sub-128 JAX tail,
                                   #  in-kernel bf16 upcast)

    pd_intr = jax.random.uniform(k1, (n_cam, n_pts, 2), jnp.float32) * img_w
    gt_intr = jax.random.uniform(k2, (n_cam, n_pts, 2), jnp.float32) * img_w
    pd_extr = jax.random.uniform(k3, (n_cam, n_pts, 2), jnp.float32) * img_w
    gt_extr = jax.random.uniform(k4, (n_cam, n_pts, 2), jnp.float32) * img_w
    rgbs_c = jax.random.uniform(k5, (n_rays, 3), jnp.float32)
    rgbs_f = jax.random.uniform(k6, (n_rays, 3), jnp.float32).astype(jnp.bfloat16)
    rgbs_gt = jax.random.uniform(k7, (n_rays, 3), jnp.float32)

    loss_dict = {
        'intr': [pd_intr, gt_intr],
        'extr': [pd_extr, gt_extr],
        'rgb': [rgbs_c, rgbs_f, rgbs_gt],
    }

    loss_fn = MC_NeRF_Loss(sys_param)

    out_cam = loss_fn(loss_dict, 'CAM_PARAM_EPOCH')
    out_all = loss_fn(loss_dict, 'FULL_EPOCH')
    jax.block_until_ready(out_cam)
    jax.block_until_ready(out_all)

    ref_cam = _reference_loss(loss_dict, 'CAM_PARAM_EPOCH', img_h, img_w)
    ref_all = _reference_loss(loss_dict, 'FULL_EPOCH', img_h, img_w)
    assert jnp.allclose(out_cam, ref_cam, rtol=3e-5, atol=1e-6), (out_cam, ref_cam)
    assert jnp.allclose(out_all, ref_all, rtol=3e-5, atol=1e-6), (out_all, ref_all)

    # rgbs_f = None branch of get_rgb_loss
    loss_dict_nf = {'rgb': [rgbs_c, None, rgbs_gt]}
    out_nf = loss_fn(loss_dict_nf, 'FULL_EPOCH')
    jax.block_until_ready(out_nf)
    ref_nf = _reference_loss(loss_dict_nf, 'FULL_EPOCH', img_h, img_w)
    assert jnp.allclose(out_nf, ref_nf, rtol=3e-5, atol=1e-6), (out_nf, ref_nf)

    print("KERNEL_OK")
</pallas_src>

<mosaic_0001>
module attributes {stable_mosaic.version = 11 : i64} {
  func.func @kernel(%arg0: i32, %arg1: i32, %arg2: memref<1056x128xf32, #tpu.memory_space<vmem>>, %arg3: memref<1056x128xf32, #tpu.memory_space<vmem>>, %arg4: memref<1x8x128xf32, #tpu.memory_space<vmem>>, %arg5: memref<8x128xf32, #tpu.memory_space<vmem>>) attributes {dimension_semantics = [#tpu.dimension_semantics<parallel>, #tpu.dimension_semantics<arbitrary>], iteration_bounds = array<i64: 2, 1>, scalar_prefetch = 0 : i64, scratch_operands = 1 : i64, tpu.core_type = #tpu.core_type<tc>, window_params = [{transform_indices = @transform_0, window_bounds = array<i64: 1056, 128>}, {transform_indices = @transform_1, window_bounds = array<i64: 1056, 128>}, {transform_indices = @transform_2, window_bounds = array<i64: 1, 8, 128>}]} {
    %c0_i32 = arith.constant 0 : i32
    %0 = arith.cmpi eq, %arg1, %c0_i32 : i32
    %1 = arith.extui %0 : i1 to i32
    %c0_i32_0 = arith.constant 0 : i32
    %2 = arith.cmpi ne, %1, %c0_i32_0 : i32
    scf.if %2 {
      %cst_13 = arith.constant 0.000000e+00 : f32
      %28 = vector.broadcast %cst_13 : f32 to vector<8x128xf32>
      %c0_14 = arith.constant 0 : index
      %c0_15 = arith.constant 0 : index
      %29 = vector.load %arg5[%c0_14, %c0_15] : memref<8x128xf32, #tpu.memory_space<vmem>>, vector<8x128xf32>
      tpu.vector_store %arg5[%c0_14, %c0_15], %28 {strides = array<i32>} : memref<8x128xf32, #tpu.memory_space<vmem>>, vector<8x128xf32>,
    } else {
    }
    %c1_i32 = arith.constant 1 : i32
    %3 = arith.muli %arg0, %c1_i32 : i32
    %4 = arith.addi %3, %arg1 : i32
    %c1056_i32 = arith.constant 1056 : i32
    %5 = arith.muli %4, %c1056_i32 : i32
    %c0 = arith.constant 0 : index
    %c0_1 = arith.constant 0 : index
    %6 = vector.load %arg5[%c0, %c0_1] : memref<8x128xf32, #tpu.memory_space<vmem>>, vector<8x128xf32>
    %c0_i32_2 = arith.constant 0 : i32
    %c2_i32 = arith.constant 2 : i32
    %7 = arith.addi %c0_i32_2, %c2_i32 : i32
    %c1_i32_3 = arith.constant 1 : i32
    %8 = scf.for %arg6 = %c0_i32_2 to %7 step %c1_i32_3 iter_args(%arg7 = %6) -> (vector<8x128xf32>)  : i32 {
      %c512_i32 = arith.constant 512 : i32
      %28 = arith.muli %arg6, %c512_i32 : i32
      %29 = tpu.assume_multiple %28, 512 : i32
      %30 = arith.index_cast %29 : i32 to index
      %c0_13 = arith.constant 0 : index
      %31 = vector.load %arg2[%30, %c0_13] : memref<1056x128xf32, #tpu.memory_space<vmem>>, vector<512x128xf32>
      %32 = arith.index_cast %29 : i32 to index
      %c0_14 = arith.constant 0 : index
      %33 = vector.load %arg3[%32, %c0_14] : memref<1056x128xf32, #tpu.memory_space<vmem>>, vector<512x128xf32>
      %34 = arith.subf %31, %33 : vector<512x128xf32>
      %35 = arith.mulf %34, %34 : vector<512x128xf32>
      %36 = arith.addi %5, %29 : i32
      %37 = tpu.iota {dimensions = array<i32: 0>} : vector<512x128xi32>
      %38 = vector.broadcast %36 : i32 to vector<512x128xi32>
      %39 = arith.addi %38, %37 : vector<512x128xi32>
      %c2109_i32_15 = arith.constant 2109 : i32
      %40 = vector.broadcast %c2109_i32_15 : i32 to vector<512x128xi32>
      %41 = arith.cmpi slt, %39, %40 : vector<512x128xi32>
      %cst_16 = arith.constant 0.000000e+00 : f32
      %42 = vector.broadcast %cst_16 : f32 to vector<512x128xf32>
      %43 = arith.select %41, %35, %42 : vector<512x128xi1>, vector<512x128xf32>
      %44 = vector.shape_cast %43 : vector<512x128xf32> to vector<64x8x128xf32>
      %cst_17 = arith.constant dense<0.000000e+00> : vector<8x128xf32>
      %45 = vector.multi_reduction <add>, %44, %cst_17 [0] : vector<64x8x128xf32> to vector<8x128xf32>
      %46 = arith.addf %arg7, %45 : vector<8x128xf32>
      scf.yield %46 : vector<8x128xf32>
    }
    %c2_i32_4 = arith.constant 2 : i32
    %c1024 = arith.constant 1024 : index
    %c0_5 = arith.constant 0 : index
    %9 = vector.load %arg2[%c1024, %c0_5] : memref<1056x128xf32, #tpu.memory_space<vmem>>, vector<32x128xf32>
    %c1024_6 = arith.constant 1024 : index
    %c0_7 = arith.constant 0 : index
    %10 = vector.load %arg3[%c1024_6, %c0_7] : memref<1056x128xf32, #tpu.memory_space<vmem>>, vector<32x128xf32>
    %11 = arith.subf %9, %10 : vector<32x128xf32>
    %12 = arith.mulf %11, %11 : vector<32x128xf32>
    %c1024_i32 = arith.constant 1024 : i32
    %13 = arith.addi %5, %c1024_i32 : i32
    %14 = tpu.iota {dimensions = array<i32: 0>} : vector<32x128xi32>
    %15 = vector.broadcast %13 : i32 to vector<32x128xi32>
    %16 = arith.addi %15, %14 : vector<32x128xi32>
    %c2109_i32 = arith.constant 2109 : i32
    %17 = vector.broadcast %c2109_i32 : i32 to vector<32x128xi32>
    %18 = arith.cmpi slt, %16, %17 : vector<32x128xi32>
    %cst = arith.constant 0.000000e+00 : f32
    %19 = vector.broadcast %cst : f32 to vector<32x128xf32>
    %20 = arith.select %18, %12, %19 : vector<32x128xi1>, vector<32x128xf32>
    %21 = vector.shape_cast %20 : vector<32x128xf32> to vector<4x8x128xf32>
    %cst_8 = arith.constant dense<0.000000e+00> : vector<8x128xf32>
    %22 = vector.multi_reduction <add>, %21, %cst_8 [0] : vector<4x8x128xf32> to vector<8x128xf32>
    %23 = arith.addf %8, %22 : vector<8x128xf32>
    %c0_9 = arith.constant 0 : index
    %c0_10 = arith.constant 0 : index
    %24 = vector.load %arg5[%c0_9, %c0_10] : memref<8x128xf32, #tpu.memory_space<vmem>>, vector<8x128xf32>
    tpu.vector_store %arg5[%c0_9, %c0_10], %23 {strides = array<i32>} : memref<8x128xf32, #tpu.memory_space<vmem>>, vector<8x128xf32>,
    %c0_i32_11 = arith.constant 0 : i32
    %25 = arith.cmpi eq, %arg1, %c0_i32_11 : i32
    %26 = arith.extui %25 : i1 to i32
    %c0_i32_12 = arith.constant 0 : i32
    %27 = arith.cmpi ne, %26, %c0_i32_12 : i32
    scf.if %27 {
      %28 = tpu.iota {dimensions = array<i32: 1>} : vector<8x128xi32>
      %c2_i32_13 = arith.constant 2 : i32
      %c0_i32_14 = arith.constant 0 : i32
      %29 = arith.cmpi eq, %c2_i32_13, %c0_i32_14 : i32
      %c1_i32_15 = arith.constant 1 : i32
      %30 = arith.select %29, %c1_i32_15, %c2_i32_13 : i32
      %31 = vector.broadcast %30 : i32 to vector<8x128xi32>
      %32 = arith.remsi %28, %31 : vector<8x128xi32>
      %c0_i32_16 = arith.constant 0 : i32
      %33 = vector.broadcast %c0_i32_16 : i32 to vector<8x128xi32>
      %34 = arith.cmpi ne, %32, %33 : vector<8x128xi32>
      %c0_i32_17 = arith.constant 0 : i32
      %35 = vector.broadcast %c0_i32_17 : i32 to vector<8x128xi32>
      %36 = arith.cmpi slt, %32, %35 : vector<8x128xi32>
      %c0_i32_18 = arith.constant 0 : i32
      %37 = arith.cmpi slt, %30, %c0_i32_18 : i32
      %38 = vector.broadcast %37 : i1 to vector<8x128xi1>
      %39 = vector.broadcast %38 : vector<8x128xi1> to vector<8x128xi1>
      %40 = arith.xori %36, %39 : vector<8x128xi1>
      %41 = arith.andi %40, %34 : vector<8x128xi1>
      %42 = vector.broadcast %30 : i32 to vector<8x128xi32>
      %43 = arith.addi %32, %42 : vector<8x128xi32>
      %44 = arith.select %41, %43, %32 : vector<8x128xi1>, vector<8x128xi32>
      %c0_i32_19 = arith.constant 0 : i32
      %45 = vector.broadcast %c0_i32_19 : i32 to vector<8x128xi32>
      %46 = arith.cmpi eq, %44, %45 : vector<8x128xi32>
      %cst_20 = arith.constant 1.000000e+00 : f32
      %cst_21 = arith.constant 1.000000e+00 : f32
      %47 = vector.broadcast %cst_20 : f32 to vector<8x128xf32>
      %48 = vector.broadcast %cst_21 : f32 to vector<8x128xf32>
      %49 = arith.select %46, %47, %48 : vector<8x128xi1>, vector<8x128xf32>
      %c0_22 = arith.constant 0 : index
      %c0_23 = arith.constant 0 : index
      %50 = vector.load %arg5[%c0_22, %c0_23] : memref<8x128xf32, #tpu.memory_space<vmem>>, vector<8x128xf32>
      %51 = arith.mulf %50, %49 : vector<8x128xf32>
      %52 = vector.shape_cast %51 : vector<8x128xf32> to vector<1x8x128xf32>
      %c0_24 = arith.constant 0 : index
      %c0_25 = arith.constant 0 : index
      %c0_26 = arith.constant 0 : index
      %53 = vector.load %arg4[%c0_24, %c0_25, %c0_26] : memref<1x8x128xf32, #tpu.memory_space<vmem>>, vector<1x8x128xf32>
      tpu.vector_store %arg4[%c0_24, %c0_25, %c0_26], %52 {strides = array<i32>} : memref<1x8x128xf32, #tpu.memory_space<vmem>>, vector<1x8x128xf32>,
    } else {
    }
    return
  }
  func.func @transform_0(%arg0: i32, %arg1: i32) -> (i32, i32) {
    %c1_i32 = arith.constant 1 : i32
    %0 = arith.muli %arg0, %c1_i32 : i32
    %1 = arith.addi %0, %arg1 : i32
    %c1_i32_0 = arith.constant 1 : i32
    %2 = arith.minsi %1, %c1_i32_0 : i32
    %c0_i32 = arith.constant 0 : i32
    %c0_i32_1 = arith.constant 0 : i32
    return %2, %c0_i32 : i32, i32
  }
  func.func @transform_1(%arg0: i32, %arg1: i32) -> (i32, i32) {
    %c1_i32 = arith.constant 1 : i32
    %0 = arith.muli %arg0, %c1_i32 : i32
    %1 = arith.addi %0, %arg1 : i32
    %c1_i32_0 = arith.constant 1 : i32
    %2 = arith.minsi %1, %c1_i32_0 : i32
    %c0_i32 = arith.constant 0 : i32
    %c0_i32_1 = arith.constant 0 : i32
    return %2, %c0_i32 : i32, i32
  }
  func.func @transform_2(%arg0: i32, %arg1: i32) -> (i32, i32, i32) {
    %c0_i32 = arith.constant 0 : i32
    %c0_i32_0 = arith.constant 0 : i32
    %c0_i32_1 = arith.constant 0 : i32
    return %arg0, %c0_i32, %c0_i32_0 : i32, i32, i32
  }
}

</mosaic_0001>

<bundles_post_ra>
// kernel: tpu_custom_call.1
= control target key start
LH: loop header
LB: loop body
LE: loop exit
PB: predicated region body
PF: predicated region fallthrough
CT: control target
= control target key end

     0   :  { %s1973_s0 = inlined_call_operand.hbm [shape: f32[2109,128], index: 0, kind: input, shape index: {}]   ;;  %s1974_s1 = inlined_call_operand.hbm [shape: f32[2109,128], index: 1, kind: input, shape index: {}]   ;;  %s1975_s2 = inlined_call_operand.hbm [shape: f32[2,8,128], index: 2, kind: output, shape index: {}]  }
   0x1   :  { %1981 = sst [smem:[#allocation18_spill]] %s1973_s0 }
   0x2   :  { %7 = vsyncpa [#allocation4], 0 }
   0x3   :  { %9 = vsyncpa [#allocation4 + $0x1], 0 }
   0x4   :  { %10 = vsyncpa [#allocation7], 0 }
   0x5   :  { %12 = vsyncpa [#allocation7 + $0x1], 0 }
   0x6   :  { %13 = vsyncpa [#allocation5], 0 }
   0x7   :  { %15 = vsyncpa [#allocation5 + $0x1], 0  ;;  %s1348_s9 = smov 0   ;;  %s1350_s10 = smov 0  }
   0x8   :  { %s1352_s11 = smov 0   ;;  %s1354_s12 = smov 0  }
   0x9   :  { %s1356_s13 = smov 0   ;;  %s1358_s14 = smov 0  }
   0xa   :  { %s1360_s15 = smov 0   ;;  %s1362_s16 = smov 0  }
   0xb   :  { %s1364_s17 = smov 0  }
   0xc LB: > { %1982 = sst [smem:[#allocation12_spill]] %s1317_s16  ;;  %s1015_s18 = sadd.s32 4294967295, %s1321_s17   ;;  %s1321_s17 = sphi %s1364_s17, %s21_s17   ;;  %s1317_s16 = sphi %s1362_s16, %s2000_s16   ;;  %s1313_s15 = sphi %s1360_s15, %s1999_s15   ;;  %s1309_s14 = sphi %s1358_s14, %s2006_s14   ;;  %s1305_s13 = sphi %s1356_s13, %s2005_s13   ;;  %s1301_s12 = sphi %s1354_s12, %s2004_s12   ;;  %s1297_s11 = sphi %s1352_s11, %s2003_s11   ;;  %s1293_s10 = sphi %s1350_s10, %s2002_s10   ;;  %s1289_s9 = sphi %s1348_s9, %s2001_s9  }
   0xd   : > { %s1016_s19 = sadd.s32 4294967294, %s1321_s17   ;;  %s33_s20 = sadd.s32 1, %s1317_s16 }
   0xe   : > { %p38_p0 = scmp.lt.s32.totalorder %s1317_s16, 1  ;;  %p35_p1 = scmp.ge.s32.totalorder %s33_s20, 2 }
   0xf   : > { %s46_s21 = sadd.s32 1, %s1309_s14  ;;  %p53_p2 = scmp.ne.s32.totalorder %s1309_s14, %s1305_s13 }
  0x10   : > { %s1397_s22 = scalar_select %p38_p0, %s1317_s16, 1 }
  0x11   : > { %s2008_s20 = smov (%p35_p1, %s33_s20), 0  ;;  %p54_p3 = scmp.eq.s32.totalorder %s1321_s17, 0 }
  0x12   : > { %1983 = sst [smem:[#allocation13_spill]] %s2008_s20  ;;  %p41_p4 = scmp.lt.s32.totalorder %s2008_s20, 1 }
  0x13   : > { %p59_p5 = scmp.ne.s32.totalorder %s1305_s13, %s1301_s12  ;;  %p1406_p6 = por %p54_p3, %p53_p2 }
  0x14   : > { %p60_p7 = scmp.eq.s32.totalorder %s1015_s18, 0  ;;  %s101_s26 = ssub.s32 %s1317_s16, %s2008_s20 }
  0x15   : > { %s42_s24 = scalar_select %p41_p4, %s2008_s20, 1 }
  0x16   : > { %p1411_p8 = por %p60_p7, %p59_p5  ;;  %p102_p9 = scmp.eq.s32.totalorder %s101_s26, 0 }
  0x17   : > { %s43_s27 = ssub.s32 %s1397_s22, %s42_s24  ;;  %s104_s28 = sadd.s32 1, %s1297_s11 }
  0x18   : > { %p44_p10 = scmp.eq.s32.totalorder %s43_s27, 0  ;;  %p114_p11 = scmp.ne.s32.totalorder %s1297_s11, %s1293_s10 }
  0x19   : > { %s1420_s29 = scalar_select %p102_p9, %s1297_s11, %s104_s28  }
  0x1a   : > { %s1423_s30 = scalar_select %p44_p10, %s1309_s14, %s46_s21  }
  0x1b   : > { %p115_p12 = scmp.eq.s32.totalorder %s1015_s18, 1  ;;  %p120_p13 = scmp.ne.s32.totalorder %s1293_s10, %s1289_s9 }
  0x1c   : > { %p121_p0 = scmp.eq.s32.totalorder %s1016_s19, 1  ;;  %p1018_p2 = scmp.ge.s32.totalorder %s1321_s17, 2 }
  0x1d   : > { %p1429_p1 = por %p115_p12, %p114_p11  ;;  %p1050_p4 = scmp.lt.s32.totalorder %s1321_s17, 2 }
  0x1e   : > { %p1434_p3 = por %p121_p0, %p120_p13  ;;  %s1440_s5 = sand.u32 1, %s1309_s14  }
  0x1f   : > { %s1028_s6 = smul.u32 1056, %s1397_s22  ;;  %s1988_s0 = sld [smem:[#allocation18_spill]] }
  0x20   : > { %s1030_s7 = smul.u32 1056, %s1440_s5  ;;  %p1449_p5 = pnand %p1050_p4, %p1406_p6 }
  0x21   : > { %s142_s27 = scalar_lea.sflag [#allocation4], %s1440_s5  ;;  %s1331_s22 = smov 128  }
  0x22   : > { %s145_s24 = scalar_lea.vmem [#allocation3], %s1030_s7  ;;  %s1332_s28 = smov 8  }
  0x23   : > { %s156_s26 = sshll.u32 %s145_s24, 4  ;;  %p1021_p7 = scmp.ge.s32.totalorder %s1321_s17, 1  ;;  %s157_s26 = int_to_ptr.vmem [resolvable:$true] %s156_s26 }
  0x24   : > { %p189_p9 = scmp.lt.s32.totalorder %s1321_s17, 3  ;;  %s178_s12 = scalar_lea.hbm %s1974_s1, %s1028_s6 }
  0x25   : > { %s153_s18 = scalar_lea.hbm %s1988_s0, %s1028_s6  ;;  %s179_s0 = sshll.u32 %s178_s12, 4  ;;  %s180_s0 = int_to_ptr.hbm [resolvable:$true] %s179_s0 }
  0x26   : > { %s154_s21 = sshll.u32 %s153_s18, 4  ;;  %p190_p10 = pnand %p1021_p7, %p189_p9  ;;  %s155_s21 = int_to_ptr.hbm [resolvable:$true] %s154_s21 }
  0x27   : > { %1042 = dma.hbm_to_vmem [thread:$0]  (!%p1449_p5), %s155_s21, 16896, %s157_s26, %s142_s27, %s1331_s22, %s1331_s22, %s1332_s28  }
  0x28   : > { %s170_s18 = scalar_lea.vmem [#allocation6], %s1030_s7  ;;  %s167_s24 = scalar_lea.sflag [#allocation7], %s1440_s5 }
  0x29   : > { %s181_s20 = sshll.u32 %s170_s18, 4  ;;  %193 = sbr.rel (%p190_p10) target bundleno = 221 (0xdd), region = 28  ;;  %s182_s20 = int_to_ptr.vmem [resolvable:$true] %s181_s20 }
  0x2a   : > { %1045 = dma.hbm_to_vmem [thread:$0]  (!%p1449_p5), %s180_s0, 16896, %s182_s20, %s167_s24, %s1331_s22, %s1331_s22, %s1332_s28  }
  0x2e   : > { %s195_s16 = sand.u32 1, %s1305_s13  }
  0x2f   : > { %s1032_s21 = smul.u32 1056, %s195_s16  ;;  %s196_s26 = scalar_lea.sflag [#allocation4], %s195_s16 }
  0x31   : > { %s1465_s27 = scalar_lea.vmem [#allocation3], %s1032_s21 }
  0x32   : > { %1276 = dma.done.wait (%p1411_p8), %s196_s26, 16896  }
  0x33   : > { %1278 = vsyncadd (%p1411_p8), %s196_s26, 4294950400  ;;  %s206_s6 = scalar_lea.sflag [#allocation7], %s195_s16  ;;  %s1471_s7 = scalar_lea.vmem [#allocation6], %s1032_s21 }
  0x34   : > { %1280 = dma.done.wait (%p1411_p8), %s206_s6, 16896  }
  0x35   : > { %1282 = vsyncadd (%p1411_p8), %s206_s6, 4294950400  ;;  %s233_s0 = sand.u32 1, %s1293_s10   ;;  %s250_s20 = smul.u32 1056, %s1313_s15  ;;  %v1484_v0 = vmov 0.0  }
  0x36   : > { %s1481_s5 = sshll.u32 %s233_s0, 3  ;;  %s1486_s16 = smov 0  }
  0x37   : > { %s235_s19 = scalar_lea.vmem [#allocation8], %s1481_s5 }
  0x38 LB: >> { %1990 = vst [vmem:[#allocation14_spill] sm:$0xff] %v1325_v0  ;;  %s1495_s25 = sshll.u32 %s1329_s16, 9  ;;  %s257_s16 = sadd.s32 1, %s1329_s16   ;;  %s1329_s16 = sphi %s1486_s16, %s257_s16   ;;  %v1325_v0 = vphi %v1484_v0, %v1995_v0  }
  0x39   : >> { %s1499_s22 = scalar_lea.vmem %s1465_s27, %s1495_s25 [#allocation3]  ;;  %s1514_s28 = scalar_lea.vmem %s1471_s7, %s1495_s25 [#allocation6] }
  0x3a   : >> { %v294_v1 = vld [vmem:[%s1499_s22 + $0x108] sm:$0xff]  ;;  %v295_v2 = vld [vmem:[%s1499_s22 + $0x110] sm:$0xff]  ;;  %v296_v3 = vld [vmem:[%s1499_s22 + $0x118] sm:$0xff]  ;;  %s518_s23 = sadd.s32 %s1495_s25, %s250_s20  ;;  %p254_p6 = scmp.ge.s32.totalorder %s257_s16, 2  }
  0x3b   : >> { %v297_v4 = vld [vmem:[%s1499_s22 + $0x120] sm:$0xff]  ;;  %v298_v5 = vld [vmem:[%s1499_s22 + $0x128] sm:$0xff]  ;;  %v299_v6 = vld [vmem:[%s1499_s22 + $0x130] sm:$0xff]  ;;  %s857_s8 = sadd.s32 (%p254_p6), 1024, %s250_s20  ;;  %s1025_s12 = sshll.u32 (%p254_p6), %s1313_s15, 3 }
  0x3c   : >> { %v300_v7 = vld [vmem:[%s1499_s22 + $0x138] sm:$0xff]  ;;  %v301_v8 = vld [vmem:[%s1499_s22 + $0x140] sm:$0xff]  ;;  %v302_v9 = vld [vmem:[%s1499_s22 + $0x148] sm:$0xff]  ;;  %s897_s21 = scalar_lea.hbm (%p254_p6), %s1975_s2, %s1025_s12  ;;  %s899_s26 = sshll.u32 (%p254_p6), %s235_s19, 4  ;;  %s900_s26 = int_to_ptr.vmem [resolvable:$true] %s899_s26 }
  0x3d   : >> { %v303_v10 = vld [vmem:[%s1499_s22 + $0x150] sm:$0xff]  ;;  %v304_v11 = vld [vmem:[%s1499_s22 + $0x158] sm:$0xff]  ;;  %v305_v12 = vld [vmem:[%s1499_s22 + $0x160] sm:$0xff]  ;;  %s887_s15 = scalar_lea.sflag (%p254_p6), [#allocation5], %s233_s0  ;;  %s1223_s25 = scalar_lea.hbm (%p254_p6), %s1975_s2, 16 }
  0x3e   : >> { %v306_v13 = vld [vmem:[%s1499_s22 + $0x168] sm:$0xff]  ;;  %v307_v14 = vld [vmem:[%s1499_s22 + $0x170] sm:$0xff]  ;;  %v308_v17 = vld [vmem:[%s1499_s22 + $0x178] sm:$0xff] }
  0x3f   : >> { %v359_v15 = vld [vmem:[%s1514_s28 + $0x108] sm:$0xff]  ;;  %v360_v16 = vld [vmem:[%s1514_s28 + $0x110] sm:$0xff]  ;;  %v309_v18 = vld [vmem:[%s1499_s22 + $0x180] sm:$0xff] }
  0x40   : >> { %v310_v19 = vld [vmem:[%s1499_s22 + $0x188] sm:$0xff]  ;;  %v361_v20 = vld [vmem:[%s1514_s28 + $0x118] sm:$0xff]  ;;  %v362_v21 = vld [vmem:[%s1514_s28 + $0x120] sm:$0xff]  ;;  %v1527_v23 = vsub.f32 %v294_v1, %v359_v15  ;;  %v1529_v24 = vsub.f32 %v295_v2, %v360_v16 }
  0x41   : >> { %v363_v22 = vld [vmem:[%s1514_s28 + $0x128] sm:$0xff]  ;;  %v311_v25 = vld [vmem:[%s1499_s22 + $0x190] sm:$0xff]  ;;  %v312_v26 = vld [vmem:[%s1499_s22 + $0x198] sm:$0xff]  ;;  %v1537_v31 = vsub.f32 %v296_v3, %v361_v20  ;;  %v1539_v32 = vsub.f32 %v297_v4, %v362_v21 }
  0x42   : >> { %v313_v27 = vld [vmem:[%s1499_s22 + $0x1a0] sm:$0xff]  ;;  %v364_v28 = vld [vmem:[%s1514_s28 + $0x130] sm:$0xff]  ;;  %v365_v29 = vld [vmem:[%s1514_s28 + $0x138] sm:$0xff]  ;;  %v1541_v33 = vsub.f32 %v298_v5, %v363_v22 }
  0x43   : >> { %v366_v30 = vld [vmem:[%s1514_s28 + $0x140] sm:$0xff]  ;;  %v314_v34 = vld [vmem:[%s1499_s22 + $0x1a8] sm:$0xff]  ;;  %v315_v35 = vld [vmem:[%s1499_s22 + $0x1b0] sm:$0xff]  ;;  %v1549_v40 = vsub.f32 %v299_v6, %v364_v28  ;;  %v1551_v41 = vsub.f32 %v300_v7, %v365_v29 }
  0x44   : >> { %v316_v36 = vld [vmem:[%s1499_s22 + $0x1b8] sm:$0xff]  ;;  %v367_v37 = vld [vmem:[%s1514_s28 + $0x148] sm:$0xff]  ;;  %v368_v38 = vld [vmem:[%s1514_s28 + $0x150] sm:$0xff]  ;;  %v1553_v42 = vsub.f32 %v301_v8, %v366_v30 }
  0x45   : >> { %v369_v39 = vld [vmem:[%s1514_s28 + $0x158] sm:$0xff]  ;;  %v317_v43 = vld [vmem:[%s1499_s22 + $0x1c0] sm:$0xff]  ;;  %v318_v44 = vld [vmem:[%s1499_s22 + $0x1c8] sm:$0xff]  ;;  %v1561_v49 = vsub.f32 %v302_v9, %v367_v37  ;;  %v1563_v50 = vsub.f32 %v303_v10, %v368_v38 }
  0x46   : >> { %v319_v45 = vld [vmem:[%s1499_s22 + $0x1d0] sm:$0xff]  ;;  %v370_v46 = vld [vmem:[%s1514_s28 + $0x160] sm:$0xff]  ;;  %v371_v47 = vld [vmem:[%s1514_s28 + $0x168] sm:$0xff]  ;;  %v1565_v51 = vsub.f32 %v304_v11, %v369_v39 }
  0x47   : >> { %v372_v48 = vld [vmem:[%s1514_s28 + $0x170] sm:$0xff]  ;;  %v320_v52 = vld [vmem:[%s1499_s22 + $0x1d8] sm:$0xff]  ;;  %v321_v53 = vld [vmem:[%s1499_s22 + $0x1e0] sm:$0xff]  ;;  %v1573_v58 = vsub.f32 %v305_v12, %v370_v46  ;;  %v1575_v59 = vsub.f32 %v306_v13, %v371_v47  ;;  %v1641_v46 = vstv %s518_s23 }
  0x48   : >> { %v322_v54 = vld [vmem:[%s1499_s22 + $0x1e8] sm:$0xff]  ;;  %v373_v55 = vld [vmem:[%s1514_s28 + $0x178] sm:$0xff]  ;;  %v374_v56 = vld [vmem:[%s1514_s28 + $0x180] sm:$0xff]  ;;  %v1577_v60 = vsub.f32 %v307_v14, %v372_v48 }
  0x49   : >> { %v375_v57 = vld [vmem:[%s1514_s28 + $0x188] sm:$0xff]  ;;  %v323_v61 = vld [vmem:[%s1499_s22 + $0x1f0] sm:$0xff]  ;;  %v324_v62 = vld [vmem:[%s1499_s22 + $0x1f8] sm:$0xff]  ;;  %v1584_v3 = vsub.f32 %v308_v17, %v373_v55  ;;  %v1586_v4 = vsub.f32 %v309_v18, %v374_v56 }
  0x4a   : >> { %v376_v63 = vld [vmem:[%s1514_s28 + $0x190] sm:$0xff]  ;;  %v377_v1 = vld [vmem:[%s1514_s28 + $0x198] sm:$0xff]  ;;  %v378_v2 = vld [vmem:[%s1514_s28 + $0x1a0] sm:$0xff]  ;;  %v1588_v5 = vsub.f32 %v310_v19, %v375_v57 }
  0x4b   : >> { %v379_v6 = vld [vmem:[%s1514_s28 + $0x1a8] sm:$0xff]  ;;  %v380_v7 = vld [vmem:[%s1514_s28 + $0x1b0] sm:$0xff]  ;;  %v381_v8 = vld [vmem:[%s1514_s28 + $0x1b8] sm:$0xff]  ;;  %v1593_v9 = vsub.f32 %v311_v25, %v376_v63  ;;  %v1595_v10 = vsub.f32 %v312_v26, %v377_v1  ;;  %v1597_v11 = vsub.f32 %v313_v27, %v378_v2 }
  0x4c   : >> { %v382_v12 = vld [vmem:[%s1514_s28 + $0x1c0] sm:$0xff]  ;;  %v383_v13 = vld [vmem:[%s1514_s28 + $0x1c8] sm:$0xff]  ;;  %v384_v14 = vld [vmem:[%s1514_s28 + $0x1d0] sm:$0xff]  ;;  %v1602_v15 = vsub.f32 %v314_v34, %v379_v6  ;;  %v1604_v16 = vsub.f32 %v315_v35, %v380_v7  ;;  %v1606_v17 = vsub.f32 %v316_v36, %v381_v8  ;;  %v519_v36 = vlaneseq }
  0x4d   : >> { %v385_v18 = vld [vmem:[%s1514_s28 + $0x1d8] sm:$0xff]  ;;  %v386_v19 = vld [vmem:[%s1514_s28 + $0x1e0] sm:$0xff]  ;;  %v387_v20 = vld [vmem:[%s1514_s28 + $0x1e8] sm:$0xff]  ;;  %v1611_v21 = vsub.f32 %v317_v43, %v382_v12  ;;  %v1613_v22 = vsub.f32 %v318_v44, %v383_v13  ;;  %v1615_v25 = vsub.f32 %v319_v45, %v384_v14 }
  0x4e   : >> { %v388_v26 = vld [vmem:[%s1514_s28 + $0x1f0] sm:$0xff]  ;;  %v389_v27 = vld [vmem:[%s1514_s28 + $0x1f8] sm:$0xff]  ;;  %v1619_v28 = vsub.f32 %v320_v52, %v385_v18  ;;  %v1621_v29 = vsub.f32 %v321_v53, %v386_v19  ;;  %v1623_v30 = vsub.f32 %v322_v54, %v387_v20  ;;  %v1629_v37 = vshrl.u32 %v519_v36, 7  ;;  %v261_v38 = vld [vmem:[%s1499_s22] sm:$0xff] }
  0x4f   : >> { %v1625_v34 = vsub.f32 %v323_v61, %v388_v26  ;;  %v1627_v35 = vsub.f32 %v324_v62, %v389_v27  ;;  %v262_v39 = vld [vmem:[%s1499_s22 + $0x8] sm:$0xff]  ;;  %v326_v43 = vld [vmem:[%s1514_s28] sm:$0xff]  ;;  %v263_v47 = vld [vmem:[%s1499_s22 + $0x10] sm:$0xff] }
  0x50   : >> { %v327_v44 = vld [vmem:[%s1514_s28 + $0x8] sm:$0xff]  ;;  %v1639_v45 = vadd.s32 8, %v1629_v37  ;;  %v328_v48 = vld [vmem:[%s1514_s28 + $0x10] sm:$0xff]  ;;  %v1646_v52 = vadd.s32 16, %v1629_v37  ;;  %v390_v53 = vsub.f32 %v261_v38, %v326_v43  ;;  %v264_v55 = vld [vmem:[%s1499_s22 + $0x18] sm:$0xff]  ;;  %v1651_v57 = vadd.s32 24, %v1629_v37 }
  0x51   : >> { %v391_v54 = vsub.f32 %v262_v39, %v327_v44  ;;  %v329_v56 = vld [vmem:[%s1514_s28 + $0x18] sm:$0xff]  ;;  %v585_v61 = vadd.s32 %v1641_v46, %v1629_v37  ;;  %v392_v63 = vsub.f32 %v263_v47, %v328_v48  ;;  %v265_v1 = vld [vmem:[%s1499_s22 + $0x20] sm:$0xff]  ;;  %v524_v6 = vadd.s32 32, %v1629_v37  ;;  %v266_v14 = vld [vmem:[%s1499_s22 + $0x28] sm:$0xff] }
  0x52   : >> { %1991 = vst [vmem:[#allocation15_spill] sm:$0xff] %v1639_v45  ;;  %v586_v62 = vadd.s32 %v1641_v46, %v1639_v45  ;;  %v330_v2 = vld [vmem:[%s1514_s28 + $0x20] sm:$0xff]  ;;  %v587_v7 = vadd.s32 %v1641_v46, %v1646_v52  ;;  %v393_v8 = vsub.f32 %v264_v55, %v329_v56  ;;  %v454_v12 = vmul.f32 %v390_v53, %v390_v53  ;;  %v331_v18 = vld [vmem:[%s1514_s28 + $0x28] sm:$0xff]  ;;  %v267_v36 = vld [vmem:[%s1499_s22 + $0x30] sm:$0xff] }
  0x53   : >> { %1992 = vst [vmem:[#allocation16_spill] sm:$0xff] %v1646_v52  ;;  %v455_v13 = vmul.f32 %v391_v54, %v391_v54  ;;  %v525_v19 = vadd.s32 40, %v1629_v37  ;;  %v588_v20 = vadd.s32 %v1641_v46, %v1651_v57  ;;  %vm649_vm0 = vcmp.lt.s32.totalorder %v585_v61, 2109  ;;  %v332_v38 = vld [vmem:[%s1514_s28 + $0x30] sm:$0xff]  ;;  %v268_v54 = vld [vmem:[%s1499_s22 + $0x38] sm:$0xff]  ;;  %v335_v52 = vld [vmem:[%s1514_s28 + $0x48] sm:$0xff] }
  0x54   : >> { %1993 = vst [vmem:[#allocation17_spill] sm:$0xff] %v1651_v57  ;;  %vm650_vm1 = vcmp.lt.s32.totalorder %v586_v62, 2109  ;;  %v394_v26 = vsub.f32 %v265_v1, %v330_v2  ;;  %v456_v27 = vmul.f32 %v392_v63, %v392_v63  ;;  %v526_v39 = vadd.s32 48, %v1629_v37  ;;  %v333_v55 = vld [vmem:[%s1514_s28 + $0x38] sm:$0xff]  ;;  %v269_v2 = vld [vmem:[%s1499_s22 + $0x40] sm:$0xff]  ;;  %v336_v45 = vld [vmem:[%s1514_s28 + $0x50] sm:$0xff] }
  0x55   : >> { %v589_v43 = vadd.s32 %v1641_v46, %v524_v6  ;;  %vm651_vm2 = vcmp.lt.s32.totalorder %v587_v7, 2109  ;;  %v395_v44 = vsub.f32 %v266_v14, %v331_v18  ;;  %v457_v47 = vmul.f32 %v393_v8, %v393_v8  ;;  %v334_v57 = vld [vmem:[%s1514_s28 + $0x40] sm:$0xff]  ;;  %v270_v18 = vld [vmem:[%s1499_s22 + $0x48] sm:$0xff] }
  0x56   : >> { %v713_v48 = vsel %vm649_vm0, %v454_v12, 0.0  ;;  %v714_v53 = vsel %vm650_vm1, %v455_v13, 0.0  ;;  %v527_v56 = vadd.s32 56, %v1629_v37  ;;  %v590_v61 = vadd.s32 %v1641_v46, %v525_v19  ;;  %v358_v0 = vld [vmem:[%s1514_s28 + $0x100] sm:$0xff] }
  0x57   : >> { %vm652_vm3 = vcmp.lt.s32.totalorder %v588_v20, 2109  ;;  %v396_v62 = vsub.f32 %v267_v36, %v332_v38  ;;  %v458_v63 = vmul.f32 %v394_v26, %v394_v26  ;;  %v715_v1 = vsel %vm651_vm2, %v456_v27, 0.0 }
  0x58   : >> { %v528_v6 = vadd.s32 64, %v1629_v37  ;;  %v591_v7 = vadd.s32 %v1641_v46, %v526_v39  ;;  %vm653_vm4 = vcmp.lt.s32.totalorder %v589_v43, 2109  ;;  %v777_v8 = vadd.f32 %v714_v53, %v713_v48  ;;  %v271_v39 = vld [vmem:[%s1499_s22 + $0x50] sm:$0xff] }
  0x59   : >> { %v397_v12 = vsub.f32 %v268_v54, %v333_v55  ;;  %v459_v13 = vmul.f32 %v395_v44, %v395_v44  ;;  %v716_v14 = vsel %vm652_vm3, %v457_v47, 0.0  ;;  %v529_v19 = vadd.s32 72, %v1629_v37  ;;  %v272_v55 = vld [vmem:[%s1499_s22 + $0x58] sm:$0xff] }
  0x5a   : >> { %v592_v20 = vadd.s32 %v1641_v46, %v527_v56  ;;  %vm654_vm5 = vcmp.lt.s32.totalorder %v590_v61, 2109  ;;  %v778_v26 = vadd.f32 %v777_v8, %v715_v1  ;;  %v398_v27 = vsub.f32 %v269_v2, %v334_v57  ;;  %v337_v56 = vld [vmem:[%s1514_s28 + $0x58] sm:$0xff]  ;;  %v338_v8 = vld [vmem:[%s1514_s28 + $0x60] sm:$0xff] }
  0x5b   : >> { %v460_v36 = vmul.f32 %v396_v62, %v396_v62  ;;  %v717_v38 = vsel %vm653_vm4, %v458_v63, 0.0  ;;  %v530_v43 = vadd.s32 80, %v1629_v37  ;;  %v593_v44 = vadd.s32 %v1641_v46, %v528_v6  ;;  %v273_v6 = vld [vmem:[%s1499_s22 + $0x60] sm:$0xff] }
  0x5c   : >> { %vm655_vm6 = vcmp.lt.s32.totalorder %v591_v7, 2109  ;;  %v779_v47 = vadd.f32 %v778_v26, %v716_v14  ;;  %v399_v48 = vsub.f32 %v270_v18, %v335_v52  ;;  %v461_v53 = vmul.f32 %v397_v12, %v397_v12  ;;  %v339_v26 = vld [vmem:[%s1514_s28 + $0x68] sm:$0xff] }
  0x5d   : >> { %v718_v54 = vsel %vm654_vm5, %v459_v13, 0.0  ;;  %v531_v61 = vadd.s32 88, %v1629_v37  ;;  %v594_v57 = vadd.s32 %v1641_v46, %v529_v19  ;;  %vm656_vm7 = vcmp.lt.s32.totalorder %v592_v20, 2109  ;;  %v274_v19 = vld [vmem:[%s1499_s22 + $0x68] sm:$0xff] }
  0x5e   : >> { %v780_v62 = vadd.f32 %v779_v47, %v717_v38  ;;  %v400_v63 = vsub.f32 %v271_v39, %v336_v45  ;;  %v462_v1 = vmul.f32 %v398_v27, %v398_v27  ;;  %v719_v2 = vsel %vm655_vm6, %v460_v36, 0.0  ;;  %v340_v47 = vld [vmem:[%s1514_s28 + $0x70] sm:$0xff] }
  0x5f   : >> { %v532_v7 = vadd.s32 96, %v1629_v37  ;;  %v595_v52 = vadd.s32 %v1641_v46, %v530_v43  ;;  %vm657_vm8 = vcmp.lt.s32.totalorder %v593_v44, 2109  ;;  %v401_v13 = vsub.f32 %v272_v55, %v337_v56  ;;  %v275_v43 = vld [vmem:[%s1499_s22 + $0x70] sm:$0xff] }
  0x60   : >> { %v781_v12 = vadd.f32 %v780_v62, %v718_v54  ;;  %v463_v14 = vmul.f32 %v399_v48, %v399_v48  ;;  %v720_v18 = vsel %vm656_vm7, %v461_v53, 0.0  ;;  %v533_v20 = vadd.s32 104, %v1629_v37  ;;  %v341_v62 = vld [vmem:[%s1514_s28 + $0x78] sm:$0xff] }
  0x61   : >> { %v596_v45 = vadd.s32 %v1641_v46, %v531_v61  ;;  %vm658_vm9 = vcmp.lt.s32.totalorder %v594_v57, 2109  ;;  %v402_v36 = vsub.f32 %v273_v6, %v338_v8  ;;  %v464_v38 = vmul.f32 %v400_v63, %v400_v63  ;;  %v276_v61 = vld [vmem:[%s1499_s22 + $0x78] sm:$0xff] }
  0x62   : >> { %v782_v27 = vadd.f32 %v781_v12, %v719_v2  ;;  %v721_v39 = vsel %vm657_vm8, %v462_v1, 0.0  ;;  %v534_v44 = vadd.s32 112, %v1629_v37  ;;  %v597_v48 = vadd.s32 %v1641_v46, %v532_v7  ;;  %v277_v7 = vld [vmem:[%s1499_s22 + $0x80] sm:$0xff] }
  0x63   : >> { %vm659_vm10 = vcmp.lt.s32.totalorder %v595_v52, 2109  ;;  %v403_v54 = vsub.f32 %v274_v19, %v339_v26  ;;  %v465_v55 = vmul.f32 %v401_v13, %v401_v13  ;;  %v722_v56 = vsel %vm658_vm9, %v463_v14, 0.0  ;;  %v342_v12 = vld [vmem:[%s1514_s28 + $0x80] sm:$0xff] }
  0x64   : >> { %v783_v53 = vadd.f32 %v782_v27, %v720_v18  ;;  %v535_v57 = vadd.s32 120, %v1629_v37  ;;  %v598_v63 = vadd.s32 %v1641_v46, %v533_v20  ;;  %vm660_vm11 = vcmp.lt.s32.totalorder %v596_v45, 2109  ;;  %v278_v20 = vld [vmem:[%s1499_s22 + $0x88] sm:$0xff] }
  0x65   : >> { %v404_v2 = vsub.f32 %v275_v43, %v340_v47  ;;  %v466_v6 = vmul.f32 %v402_v36, %v402_v36  ;;  %v723_v8 = vsel %vm659_vm10, %v464_v38, 0.0  ;;  %v536_v52 = vadd.s32 128, %v1629_v37  ;;  %v343_v27 = vld [vmem:[%s1514_s28 + $0x88] sm:$0xff] }
  0x66   : >> { %v784_v1 = vadd.f32 %v783_v53, %v721_v39  ;;  %v599_v13 = vadd.s32 %v1641_v46, %v534_v44  ;;  %vm661_vm12 = vcmp.lt.s32.totalorder %v597_v48, 2109  ;;  %v405_v18 = vsub.f32 %v276_v61, %v341_v62  ;;  %v279_v44 = vld [vmem:[%s1499_s22 + $0x90] sm:$0xff] }
  0x67   : >> { %v467_v19 = vmul.f32 %v403_v54, %v403_v54  ;;  %v724_v26 = vsel %vm660_vm11, %v465_v55, 0.0  ;;  %v537_v45 = vadd.s32 136, %v1629_v37  ;;  %v600_v36 = vadd.s32 %v1641_v46, %v535_v57  ;;  %v344_v53 = vld [vmem:[%s1514_s28 + $0x90] sm:$0xff]  ;;  %v280_v57 = vld [vmem:[%s1499_s22 + $0x98] sm:$0xff] }
  0x68   : >> { %v785_v14 = vadd.f32 %v784_v1, %v722_v56  ;;  %vm662_vm13 = vcmp.lt.s32.totalorder %v598_v63, 2109  ;;  %v406_v39 = vsub.f32 %v277_v7, %v342_v12  ;;  %v468_v43 = vmul.f32 %v404_v2, %v404_v2  ;;  %v345_v1 = vld [vmem:[%s1514_s28 + $0x98] sm:$0xff] }
  0x69   : >> { %v725_v47 = vsel %vm661_vm12, %v466_v6, 0.0  ;;  %v538_v48 = vadd.s32 144, %v1629_v37  ;;  %v601_v54 = vadd.s32 %v1641_v46, %v536_v52  ;;  %vm663_vm14 = vcmp.lt.s32.totalorder %v599_v13, 2109  ;;  %v281_v52 = vld [vmem:[%s1499_s22 + $0xa0] sm:$0xff] }
  0x6a   : >> { %v786_v38 = vadd.f32 %v785_v14, %v723_v8  ;;  %v407_v56 = vsub.f32 %v278_v20, %v343_v27  ;;  %v469_v61 = vmul.f32 %v405_v18, %v405_v18  ;;  %v726_v62 = vsel %vm662_vm13, %v467_v19, 0.0  ;;  %v346_v14 = vld [vmem:[%s1514_s28 + $0xa0] sm:$0xff] }
  0x6b   : >> { %v539_v63 = vadd.s32 152, %v1629_v37  ;;  %v602_v2 = vadd.s32 %v1641_v46, %v537_v45  ;;  %vm664_vm15 = vcmp.lt.s32.totalorder %v600_v36, 2109  ;;  %v408_v8 = vsub.f32 %v279_v44, %v344_v53  ;;  %v282_v45 = vld [vmem:[%s1499_s22 + $0xa8] sm:$0xff] }
  0x6c   : >> { %v787_v55 = vadd.f32 %v786_v38, %v724_v26  ;;  %v470_v7 = vmul.f32 %v406_v39, %v406_v39  ;;  %v727_v12 = vsel %vm663_vm14, %v468_v43, 0.0  ;;  %v540_v13 = vadd.s32 160, %v1629_v37  ;;  %v347_v38 = vld [vmem:[%s1514_s28 + $0xa8] sm:$0xff] }
  0x6d   : >> { %v603_v18 = vadd.s32 %v1641_v46, %v538_v48  ;;  %vm665_vm0 = vcmp.lt.s32.totalorder %v601_v54, 2109  ;;  %v409_v26 = vsub.f32 %v280_v57, %v345_v1  ;;  %v471_v20 = vmul.f32 %v407_v56, %v407_v56  ;;  %v283_v48 = vld [vmem:[%s1499_s22 + $0xb0] sm:$0xff] }
  0x6e   : >> { %v788_v6 = vadd.f32 %v787_v55, %v725_v47  ;;  %v728_v27 = vsel %vm664_vm15, %v469_v61, 0.0  ;;  %v541_v36 = vadd.s32 168, %v1629_v37  ;;  %v604_v39 = vadd.s32 %v1641_v46, %v539_v63  ;;  %v348_v55 = vld [vmem:[%s1514_s28 + $0xb0] sm:$0xff]  ;;  %v284_v63 = vld [vmem:[%s1499_s22 + $0xb8] sm:$0xff] }
  0x6f   : >> { %vm666_vm1 = vcmp.lt.s32.totalorder %v602_v2, 2109  ;;  %v410_v47 = vsub.f32 %v281_v52, %v346_v14  ;;  %v472_v44 = vmul.f32 %v408_v8, %v408_v8  ;;  %v729_v53 = vsel %vm665_vm0, %v470_v7, 0.0 }
  0x70   : >> { %v789_v19 = vadd.f32 %v788_v6, %v726_v62  ;;  %v542_v54 = vadd.s32 176, %v1629_v37  ;;  %v605_v56 = vadd.s32 %v1641_v46, %v540_v13  ;;  %vm667_vm2 = vcmp.lt.s32.totalorder %v603_v18, 2109  ;;  %v349_v6 = vld [vmem:[%s1514_s28 + $0xb8] sm:$0xff]  ;;  %v285_v13 = vld [vmem:[%s1499_s22 + $0xc0] sm:$0xff] }
  0x71   : >> { %v411_v62 = vsub.f32 %v282_v45, %v347_v38  ;;  %v473_v57 = vmul.f32 %v409_v26, %v409_v26  ;;  %v730_v1 = vsel %vm666_vm1, %v471_v20, 0.0  ;;  %v543_v2 = vadd.s32 184, %v1629_v37 }
  0x72   : >> { %v790_v43 = vadd.f32 %v789_v19, %v727_v12  ;;  %v606_v8 = vadd.s32 %v1641_v46, %v541_v36  ;;  %vm668_vm3 = vcmp.lt.s32.totalorder %v604_v39, 2109  ;;  %v412_v12 = vsub.f32 %v283_v48, %v348_v55  ;;  %v350_v19 = vld [vmem:[%s1514_s28 + $0xc0] sm:$0xff]  ;;  %v286_v36 = vld [vmem:[%s1499_s22 + $0xc8] sm:$0xff] }
  0x73   : >> { %v474_v52 = vmul.f32 %v410_v47, %v410_v47  ;;  %v731_v14 = vsel %vm667_vm2, %v472_v44, 0.0  ;;  %v544_v18 = vadd.s32 192, %v1629_v37  ;;  %v607_v26 = vadd.s32 %v1641_v46, %v542_v54  ;;  %v287_v54 = vld [vmem:[%s1499_s22 + $0xd0] sm:$0xff] }
  0x74   : >> { %v791_v61 = vadd.f32 %v790_v43, %v728_v27  ;;  %vm669_vm4 = vcmp.lt.s32.totalorder %v605_v56, 2109  ;;  %v413_v27 = vsub.f32 %v284_v63, %v349_v6  ;;  %v475_v45 = vmul.f32 %v411_v62, %v411_v62  ;;  %v351_v43 = vld [vmem:[%s1514_s28 + $0xc8] sm:$0xff] }
  0x75   : >> { %v732_v38 = vsel %vm668_vm3, %v473_v57, 0.0  ;;  %v545_v39 = vadd.s32 200, %v1629_v37  ;;  %v608_v47 = vadd.s32 %v1641_v46, %v543_v2  ;;  %vm670_vm5 = vcmp.lt.s32.totalorder %v606_v8, 2109  ;;  %v288_v2 = vld [vmem:[%s1499_s22 + $0xd8] sm:$0xff] }
  0x76   : >> { %v792_v7 = vadd.f32 %v791_v61, %v729_v53  ;;  %v414_v53 = vsub.f32 %v285_v13, %v350_v19  ;;  %v476_v48 = vmul.f32 %v412_v12, %v412_v12  ;;  %v733_v55 = vsel %vm669_vm4, %v474_v52, 0.0  ;;  %v352_v61 = vld [vmem:[%s1514_s28 + $0xd0] sm:$0xff] }
  0x77   : >> { %v546_v56 = vadd.s32 208, %v1629_v37  ;;  %v609_v62 = vadd.s32 %v1641_v46, %v544_v18  ;;  %vm671_vm6 = vcmp.lt.s32.totalorder %v607_v26, 2109  ;;  %v477_v63 = vmul.f32 %v413_v27, %v413_v27  ;;  %v289_v18 = vld [vmem:[%s1499_s22 + $0xe0] sm:$0xff] }
  0x78   : >> { %v793_v20 = vadd.f32 %v792_v7, %v730_v1  ;;  %v415_v1 = vsub.f32 %v286_v36, %v351_v43  ;;  %v734_v6 = vsel %vm670_vm5, %v475_v45, 0.0  ;;  %v353_v7 = vld [vmem:[%s1514_s28 + $0xd8] sm:$0xff]  ;;  %v547_v8 = vadd.s32 216, %v1629_v37 }
  0x79   : >> { %v610_v12 = vadd.s32 %v1641_v46, %v545_v39  ;;  %vm672_vm7 = vcmp.lt.s32.totalorder %v608_v47, 2109  ;;  %v478_v13 = vmul.f32 %v414_v53, %v414_v53  ;;  %v735_v19 = vsel %vm671_vm6, %v476_v48, 0.0  ;;  %v290_v39 = vld [vmem:[%s1499_s22 + $0xe8] sm:$0xff] }
  0x7a   : >> { %v794_v44 = vadd.f32 %v793_v20, %v731_v14  ;;  %v416_v14 = vsub.f32 %v287_v54, %v352_v61  ;;  %v354_v20 = vld [vmem:[%s1514_s28 + $0xe0] sm:$0xff]  ;;  %v548_v26 = vadd.s32 224, %v1629_v37  ;;  %v611_v27 = vadd.s32 %v1641_v46, %v546_v56  ;;  %v291_v56 = vld [vmem:[%s1499_s22 + $0xf0] sm:$0xff] }
  0x7b   : >> { %vm673_vm8 = vcmp.lt.s32.totalorder %v609_v62, 2109  ;;  %v479_v36 = vmul.f32 %v415_v1, %v415_v1  ;;  %v736_v43 = vsel %vm672_vm7, %v477_v63, 0.0  ;;  %v549_v47 = vadd.s32 232, %v1629_v37 }
  0x7c   : >> { %v795_v57 = vadd.f32 %v794_v44, %v732_v38  ;;  %v417_v38 = vsub.f32 %v288_v2, %v353_v7  ;;  %v355_v44 = vld [vmem:[%s1514_s28 + $0xe8] sm:$0xff]  ;;  %v612_v53 = vadd.s32 %v1641_v46, %v547_v8  ;;  %vm674_vm9 = vcmp.lt.s32.totalorder %v610_v12, 2109  ;;  %v292_v8 = vld [vmem:[%s1499_s22 + $0xf8] sm:$0xff] }
  0x7d   : >> { %v480_v54 = vmul.f32 %v416_v14, %v416_v14  ;;  %v737_v61 = vsel %vm673_vm8, %v478_v13, 0.0  ;;  %v550_v62 = vadd.s32 240, %v1629_v37  ;;  %v613_v1 = vadd.s32 %v1641_v46, %v548_v26 }
  0x7e   : >> { %v796_v52 = vadd.f32 %v795_v57, %v733_v55  ;;  %v418_v55 = vsub.f32 %v289_v18, %v354_v20  ;;  %v356_v57 = vld [vmem:[%s1514_s28 + $0xf0] sm:$0xff]  ;;  %vm675_vm10 = vcmp.lt.s32.totalorder %v611_v27, 2109  ;;  %v481_v2 = vmul.f32 %v417_v38, %v417_v38 }
  0x7f   : >> { %v738_v7 = vsel %vm674_vm9, %v479_v36, 0.0  ;;  %v551_v12 = vadd.s32 248, %v1629_v37  ;;  %v614_v14 = vadd.s32 %v1641_v46, %v549_v47  ;;  %vm676_vm11 = vcmp.lt.s32.totalorder %v612_v53, 2109 }
  0x80   : >> { %v797_v45 = vadd.f32 %v796_v52, %v734_v6  ;;  %v419_v6 = vsub.f32 %v290_v39, %v355_v44  ;;  %v357_v52 = vld [vmem:[%s1514_s28 + $0xf8] sm:$0xff]  ;;  %v482_v18 = vmul.f32 %v418_v55, %v418_v55  ;;  %v739_v20 = vsel %vm675_vm10, %v480_v54, 0.0 }
  0x81   : >> { %v552_v26 = vadd.s32 256, %v1629_v37  ;;  %v615_v27 = vadd.s32 %v1641_v46, %v550_v62  ;;  %vm677_vm12 = vcmp.lt.s32.totalorder %v613_v1, 2109  ;;  %v421_v36 = vsub.f32 %v292_v8, %v357_v52 }
  0x82   : >> { %v798_v48 = vadd.f32 %v797_v45, %v735_v19  ;;  %v420_v19 = vsub.f32 %v291_v56, %v356_v57  ;;  %v293_v45 = vld [vmem:[%s1499_s22 + $0x100] sm:$0xff]  ;;  %v740_v39 = vsel %vm676_vm11, %v481_v2, 0.0  ;;  %v553_v44 = vadd.s32 264, %v1629_v37 }
  0x83   : >> { %v616_v47 = vadd.s32 %v1641_v46, %v551_v12  ;;  %vm678_vm13 = vcmp.lt.s32.totalorder %v614_v14, 2109  ;;  %v741_v54 = vsel %vm677_vm12, %v482_v18, 0.0  ;;  %v617_v56 = vadd.s32 %v1641_v46, %v552_v26 }
  0x84   : >> { %v799_v63 = vadd.f32 %v798_v48, %v736_v43  ;;  %v483_v43 = vmul.f32 %v419_v6, %v419_v6  ;;  %v422_v48 = vsub.f32 %v293_v45, %v358_v0  ;;  %v484_v55 = vmul.f32 %v420_v19, %v420_v19 }
  0x85   : >> { %vm679_vm14 = vcmp.lt.s32.totalorder %v615_v27, 2109  ;;  %v485_v62 = vmul.f32 %v421_v36, %v421_v36  ;;  %v618_v6 = vadd.s32 %v1641_v46, %v553_v44  ;;  %vm680_vm15 = vcmp.lt.s32.totalorder %v616_v47, 2109 }
  0x86   : >> { %v800_v13 = vadd.f32 %v799_v63, %v737_v61  ;;  %v554_v61 = vadd.s32 272, %v1629_v37  ;;  %v742_v1 = vsel %vm678_vm13, %v483_v43, 0.0  ;;  %v555_v63 = vadd.s32 280, %v1629_v37 }
  0x87   : >> { %v743_v8 = vsel %vm679_vm14, %v484_v55, 0.0  ;;  %v556_v0 = vadd.s32 288, %v1629_v37  ;;  %vm681_vm0 = vcmp.lt.s32.totalorder %v617_v56, 2109  ;;  %v487_v14 = vmul.f32 %v1527_v23, %v1527_v23 }
  0x88   : >> { %v801_v38 = vadd.f32 %v800_v13, %v738_v7  ;;  %v486_v7 = vmul.f32 %v422_v48, %v422_v48  ;;  %v619_v52 = vadd.s32 %v1641_v46, %v554_v61  ;;  %v744_v13 = vsel %vm680_vm15, %v485_v62, 0.0 }
  0x89   : >> { %v557_v19 = vadd.s32 296, %v1629_v37  ;;  %v620_v18 = vadd.s32 %v1641_v46, %v555_v63  ;;  %vm682_vm1 = vcmp.lt.s32.totalorder %v618_v6, 2109  ;;  %v488_v45 = vmul.f32 %v1529_v24, %v1529_v24 }
  0x8a   : >> { %v802_v53 = vadd.f32 %v801_v38, %v739_v20  ;;  %v745_v26 = vsel %vm681_vm0, %v486_v7, 0.0  ;;  %v558_v27 = vadd.s32 304, %v1629_v37  ;;  %v621_v38 = vadd.s32 %v1641_v46, %v556_v0 }
  0x8b   : >> { %vm683_vm2 = vcmp.lt.s32.totalorder %v619_v52, 2109  ;;  %v489_v23 = vmul.f32 %v1537_v31, %v1537_v31  ;;  %v746_v43 = vsel %vm682_vm1, %v487_v14, 0.0  ;;  %v622_v44 = vadd.s32 %v1641_v46, %v557_v19 }
  0x8c   : >> { %v803_v57 = vadd.f32 %v802_v53, %v740_v39  ;;  %v559_v39 = vadd.s32 312, %v1629_v37  ;;  %vm684_vm3 = vcmp.lt.s32.totalorder %v620_v18, 2109  ;;  %v490_v24 = vmul.f32 %v1539_v32, %v1539_v32 }
  0x8d   : >> { %v747_v53 = vsel %vm683_vm2, %v488_v45, 0.0  ;;  %v560_v48 = vadd.s32 320, %v1629_v37  ;;  %v623_v55 = vadd.s32 %v1641_v46, %v558_v27  ;;  %vm685_vm4 = vcmp.lt.s32.totalorder %v621_v38, 2109 }
  0x8e   : >> { %v804_v2 = vadd.f32 %v803_v57, %v741_v54  ;;  %v491_v31 = vmul.f32 %v1541_v33, %v1541_v33  ;;  %v748_v61 = vsel %vm684_vm3, %v489_v23, 0.0  ;;  %v561_v56 = vadd.s32 328, %v1629_v37 }
  0x8f   : >> { %v624_v57 = vadd.s32 %v1641_v46, %v559_v39  ;;  %vm686_vm5 = vcmp.lt.s32.totalorder %v622_v44, 2109  ;;  %v492_v32 = vmul.f32 %v1549_v40, %v1549_v40  ;;  %v562_v63 = vadd.s32 336, %v1629_v37 }
  0x90   : >> { %v805_v12 = vadd.f32 %v804_v2, %v742_v1  ;;  %v749_v1 = vsel %vm685_vm4, %v490_v24, 0.0  ;;  %v625_v6 = vadd.s32 %v1641_v46, %v560_v48  ;;  %vm687_vm6 = vcmp.lt.s32.totalorder %v623_v55, 2109 }
  0x91   : >> { %v493_v33 = vmul.f32 %v1551_v41, %v1551_v41  ;;  %v750_v7 = vsel %vm686_vm5, %v491_v31, 0.0  ;;  %v626_v0 = vadd.s32 %v1641_v46, %v561_v56  ;;  %vm688_vm7 = vcmp.lt.s32.totalorder %v624_v57, 2109 }
  0x92   : >> { %v806_v20 = vadd.f32 %v805_v12, %v743_v8  ;;  %v563_v8 = vadd.s32 344, %v1629_v37  ;;  %v494_v40 = vmul.f32 %v1553_v42, %v1553_v42  ;;  %v751_v12 = vsel %vm687_vm6, %v492_v32, 0.0 }
  0x93   : >> { %v564_v14 = vadd.s32 352, %v1629_v37  ;;  %vm689_vm8 = vcmp.lt.s32.totalorder %v625_v6, 2109  ;;  %v495_v41 = vmul.f32 %v1561_v49, %v1561_v49  ;;  %v752_v18 = vsel %vm688_vm7, %v493_v33, 0.0 }
  0x94   : >> { %v807_v36 = vadd.f32 %v806_v20, %v744_v13  ;;  %v627_v13 = vadd.s32 %v1641_v46, %v562_v63  ;;  %v565_v20 = vadd.s32 360, %v1629_v37  ;;  %v628_v45 = vadd.s32 %v1641_v46, %v563_v8 }
  0x95   : >> { %vm690_vm9 = vcmp.lt.s32.totalorder %v626_v0, 2109  ;;  %v496_v42 = vmul.f32 %v1563_v50, %v1563_v50  ;;  %v753_v27 = vsel %vm689_vm8, %v494_v40, 0.0  ;;  %v566_v38 = vadd.s32 368, %v1629_v37 }
  0x96   : >> { %v808_v47 = vadd.f32 %v807_v36, %v745_v26  ;;  %v629_v36 = vadd.s32 %v1641_v46, %v564_v14  ;;  %vm691_vm10 = vcmp.lt.s32.totalorder %v627_v13, 2109  ;;  %v497_v49 = vmul.f32 %v1565_v51, %v1565_v51 }
  0x97   : >> { %v567_v39 = vadd.s32 376, %v1629_v37  ;;  %v630_v44 = vadd.s32 %v1641_v46, %v565_v20  ;;  %vm692_vm11 = vcmp.lt.s32.totalorder %v628_v45, 2109  ;;  %v498_v50 = vmul.f32 %v1573_v58, %v1573_v58 }
  0x98   : >> { %v809_v54 = vadd.f32 %v808_v47, %v746_v43  ;;  %v754_v43 = vsel %vm690_vm9, %v495_v41, 0.0  ;;  %v755_v24 = vsel %vm691_vm10, %v496_v42, 0.0  ;;  %v631_v48 = vadd.s32 %v1641_v46, %v566_v38 }
  0x99   : >> { %vm693_vm12 = vcmp.lt.s32.totalorder %v629_v36, 2109  ;;  %v499_v51 = vmul.f32 %v1575_v59, %v1575_v59  ;;  %v569_v31 = vadd.s32 392, %v1629_v37  ;;  %vm694_vm13 = vcmp.lt.s32.totalorder %v630_v44, 2109 }
  0x9a   : >> { %v810_v62 = vadd.f32 %v809_v54, %v747_v53  ;;  %v568_v53 = vadd.s32 384, %v1629_v37  ;;  %v756_v54 = vsel %vm692_vm11, %v497_v49, 0.0  ;;  %v500_v58 = vmul.f32 %v1577_v60, %v1577_v60 }
  0x9b   : >> { %v757_v57 = vsel %vm693_vm12, %v498_v50, 0.0  ;;  %vm695_vm14 = vcmp.lt.s32.totalorder %v631_v48, 2109  ;;  %v501_v59 = vmul.f32 %v1584_v3, %v1584_v3  ;;  %v758_v63 = vsel %vm694_vm13, %v499_v51, 0.0 }
  0x9c   : >> { %v811_v2 = vadd.f32 %v810_v62, %v748_v61  ;;  %v632_v61 = vadd.s32 %v1641_v46, %v567_v39  ;;  %v570_v62 = vadd.s32 400, %v1629_v37  ;;  %v633_v32 = vadd.s32 %v1641_v46, %v568_v53 }
  0x9d   : >> { %v571_v6 = vadd.s32 408, %v1629_v37  ;;  %v502_v60 = vmul.f32 %v1586_v4, %v1586_v4  ;;  %v572_v8 = vadd.s32 416, %v1629_v37  ;;  %v503_v3 = vmul.f32 %v1588_v5, %v1588_v5 }
  0x9e   : >> { %v812_v52 = vadd.f32 %v811_v2, %v749_v1  ;;  %v634_v2 = vadd.s32 %v1641_v46, %v569_v31  ;;  %vm696_vm15 = vcmp.lt.s32.totalorder %v632_v61, 2109  ;;  %v635_v0 = vadd.s32 %v1641_v46, %v570_v62 }
  0x9f   : >> { %vm697_vm0 = vcmp.lt.s32.totalorder %v633_v32, 2109  ;;  %v760_v40 = vsel %vm696_vm15, %v501_v59, 0.0  ;;  %v636_v14 = vadd.s32 %v1641_v46, %v571_v6  ;;  %v504_v4 = vmul.f32 %v1593_v9, %v1593_v9 }
  0xa0   : >> { %v813_v19 = vadd.f32 %v812_v52, %v750_v7  ;;  %v759_v7 = vsel %vm695_vm14, %v500_v58, 0.0  ;;  %vm698_vm1 = vcmp.lt.s32.totalorder %v634_v2, 2109  ;;  %v574_v41 = vadd.s32 432, %v1629_v37 }
  0xa1   : >> { %vm699_vm2 = vcmp.lt.s32.totalorder %v635_v0, 2109  ;;  %v505_v5 = vmul.f32 %v1595_v10, %v1595_v10  ;;  %v762_v45 = vsel %vm698_vm1, %v503_v3, 0.0  ;;  %vm700_vm3 = vcmp.lt.s32.totalorder %v636_v14, 2109 }
  0xa2   : >> { %v814_v26 = vadd.f32 %v813_v19, %v751_v12  ;;  %v573_v12 = vadd.s32 424, %v1629_v37  ;;  %v761_v19 = vsel %vm697_vm0, %v502_v60, 0.0  ;;  %v506_v9 = vmul.f32 %v1597_v11, %v1597_v11 }
  0xa3   : >> { %v763_v38 = vsel %vm699_vm2, %v504_v4, 0.0  ;;  %v576_v36 = vadd.s32 448, %v1629_v37  ;;  %v507_v10 = vmul.f32 %v1602_v15, %v1602_v15  ;;  %v577_v39 = vadd.s32 456, %v1629_v37 }
  0xa4   : >> { %v815_v23 = vadd.f32 %v814_v26, %v752_v18  ;;  %v637_v18 = vadd.s32 %v1641_v46, %v572_v8  ;;  %v575_v26 = vadd.s32 440, %v1629_v37  ;;  %v638_v42 = vadd.s32 %v1641_v46, %v573_v12 }
  0xa5   : >> { %v508_v11 = vmul.f32 %v1604_v16, %v1604_v16  ;;  %v641_v53 = vadd.s32 %v1641_v46, %v576_v36  ;;  %v509_v15 = vmul.f32 %v1606_v17, %v1606_v17  ;;  %v579_v51 = vadd.s32 472, %v1629_v37  ;;  %v845_v36 = vld [vmem:[%s1471_s7 + $0x400] sm:$0xff] (%p254_p6) }
  0xa6   : >> { %v816_v47 = vadd.f32 %v815_v23, %v753_v27  ;;  %v639_v23 = vadd.s32 %v1641_v46, %v574_v41  ;;  %vm701_vm4 = vcmp.lt.s32.totalorder %v637_v18, 2109  ;;  %v640_v44 = vadd.s32 %v1641_v46, %v575_v26 }
  0xa7   : >> { %vm702_vm5 = vcmp.lt.s32.totalorder %v638_v42, 2109  ;;  %v765_v50 = vsel %vm701_vm4, %v506_v9, 0.0  ;;  %v510_v16 = vmul.f32 %v1611_v21, %v1611_v21  ;;  %vm705_vm8 = vcmp.lt.s32.totalorder %v641_v53, 2109  ;;  %v843_v9 = vld [vmem:[%s1465_s27 + $0x410] sm:$0xff] (%p254_p6) }
  0xa8   : >> { %v817_v55 = vadd.f32 %v816_v47, %v754_v43  ;;  %v764_v43 = vsel %vm700_vm3, %v505_v5, 0.0  ;;  %vm703_vm6 = vcmp.lt.s32.totalorder %v639_v23, 2109  ;;  %vm704_vm7 = vcmp.lt.s32.totalorder %v640_v44, 2109  ;;  %v846_v23 = vld [vmem:[%s1471_s7 + $0x408] sm:$0xff] (%p254_p6) }
  0xa9   : >> { %v767_v61 = vsel %vm703_vm6, %v508_v11, 0.0  ;;  %v511_v17 = vmul.f32 %v1613_v22, %v1613_v22  ;;  %v768_v62 = vsel %vm704_vm7, %v509_v15, 0.0  ;;  %v581_v32 = vadd.s32 488, %v1629_v37  ;;  %v1996_v11 = vld [vmem:[#allocation15_spill] sm:$0xff] (%p254_p6) }
  0xaa   : >> { %v818_v56 = vadd.f32 %v817_v55, %v755_v24  ;;  %v578_v24 = vadd.s32 464, %v1629_v37  ;;  %v766_v55 = vsel %vm702_vm5, %v507_v10, 0.0  ;;  %v512_v21 = vmul.f32 %v1615_v25, %v1615_v25  ;;  %v847_v10 = vld [vmem:[%s1471_s7 + $0x410] sm:$0xff] (%p254_p6) }
  0xab   : >> { %v582_v6 = vadd.s32 496, %v1629_v37  ;;  %v513_v22 = vmul.f32 %v1619_v28, %v1619_v28  ;;  %v646_v8 = vadd.s32 %v1641_v46, %v581_v32  ;;  %v514_v25 = vmul.f32 %v1621_v29, %v1621_v29 }
  0xac   : >> { %v819_v1 = vadd.f32 %v818_v56, %v756_v54  ;;  %v642_v54 = vadd.s32 %v1641_v46, %v577_v39  ;;  %v580_v56 = vadd.s32 480, %v1629_v37  ;;  %v643_v58 = vadd.s32 %v1641_v46, %v578_v24 }
  0xad   : >> { %v647_v3 = vadd.s32 %v1641_v46, %v582_v6  ;;  %v515_v12 = vmul.f32 %v1623_v30, %v1623_v30  ;;  %vm710_vm13 = vcmp.lt.s32.totalorder %v646_v8, 2109  ;;  %v516_v4 = vmul.f32 %v1625_v34, %v1625_v34  ;;  %v841_v34 = vld [vmem:[%s1465_s27 + $0x400] sm:$0xff] (%p254_p6) }
  0xae   : >> { %v820_v33 = vadd.f32 %v819_v1, %v757_v57  ;;  %v644_v1 = vadd.s32 %v1641_v46, %v579_v51  ;;  %vm706_vm9 = vcmp.lt.s32.totalorder %v642_v54, 2109  ;;  %v645_v2 = vadd.s32 %v1641_v46, %v580_v56 }
  0xaf   : >> { %vm707_vm10 = vcmp.lt.s32.totalorder %v643_v58, 2109  ;;  %v770_v60 = vsel %vm706_vm9, %v511_v17, 0.0  ;;  %vm711_vm14 = vcmp.lt.s32.totalorder %v647_v3, 2109  ;;  %v517_v29 = vmul.f32 %v1627_v35, %v1627_v35  ;;  %v842_v35 = vld [vmem:[%s1465_s27 + $0x408] sm:$0xff] (%p254_p6) }
  0xb0   : >> { %v821_v52 = vadd.f32 %v820_v33, %v758_v63  ;;  %v769_v63 = vsel %vm705_vm8, %v510_v16, 0.0  ;;  %vm708_vm11 = vcmp.lt.s32.totalorder %v644_v1, 2109  ;;  %vm709_vm12 = vcmp.lt.s32.totalorder %v645_v2, 2109 }
  0xb1   : >> { %v772_v14 = vsel %vm708_vm11, %v513_v22, 0.0  ;;  %v774_v18 = vsel %vm710_vm13, %v515_v12, 0.0  ;;  %v775_v5 = vsel %vm711_vm14, %v516_v4, 0.0  ;;  %v849_v39 = vsub.f32 (%p254_p6), %v841_v34, %v845_v36 }
  0xb2   : >> { %v822_v13 = vadd.f32 %v821_v52, %v759_v7  ;;  %v583_v7 = vadd.s32 504, %v1629_v37  ;;  %v771_v52 = vsel %vm707_vm10, %v512_v21, 0.0  ;;  %v850_v44 = vsub.f32 (%p254_p6), %v842_v35, %v846_v23 }
  0xb3   : > { %v851_v24 = vsub.f32 (%p254_p6), %v843_v9, %v847_v10  ;;  %v853_v54 = vmul.f32 (%p254_p6), %v849_v39, %v849_v39 }
  0xb4   : >> { %v823_v20 = vadd.f32 %v822_v13, %v760_v40  ;;  %v648_v28 = vadd.s32 %v1641_v46, %v583_v7  ;;  %v1994_v46 = vld [vmem:[#allocation14_spill] sm:$0xff] }
  0xb5   : > { %v855_v16 = vmul.f32 (%p254_p6), %v851_v24, %v851_v24 }
  0xb6   : >> { %v824_v27 = vadd.f32 %v823_v20, %v761_v19  ;;  %v773_v19 = vsel %vm709_vm12, %v514_v25, 0.0  ;;  %vm712_vm15 = vcmp.lt.s32.totalorder %v648_v28, 2109 }
  0xb7   : >> { %v776_v30 = vsel %vm712_vm15, %v517_v29, 0.0 }
  0xb8   : >> { %v825_v49 = vadd.f32 %v824_v27, %v762_v45 }
  0xba   : >> { %v826_v47 = vadd.f32 %v825_v49, %v763_v38  ;;  %v844_v38 = vld [vmem:[%s1465_s27 + $0x418] sm:$0xff] (%p254_p6)  ;;  %v863_v49 = vstv (%p254_p6), %s857_s8  ;;  %s901_s27 = sshll.u32 (%p254_p6), %s897_s21, 4  ;;  %s902_s27 = int_to_ptr.hbm [resolvable:$true] %s901_s27 }
  0xbb   : > { %s1217_s6 = sshra.s32 (%p254_p6), %s902_s27, 4  ;;  %s1218_s6 = int_to_ptr.hbm [resolvable:$true] %s1217_s6 }
  0xbc   : >> { %v827_v48 = vadd.f32 %v826_v47, %v764_v43  ;;  %v848_v43 = vld [vmem:[%s1471_s7 + $0x418] sm:$0xff] (%p254_p6)  ;;  %v864_v47 = vadd.s32 (%p254_p6), %v863_v49, %v1629_v37  ;;  %s1219_s7 = scalar_lea.hbm (%p254_p6), %s1218_s6, 8  ;;  %p1224_p13 = scmp.lt.s32.totalorder (%p254_p6), %s1218_s6, %s1975_s2 }
  0xbd   : > { %v852_v53 = vsub.f32 (%p254_p6), %v844_v38, %v848_v43  ;;  %p1220_p8 = scmp.ne.s32.totalorder (%p254_p6), %s1218_s6, %s1219_s7  ;;  %p1225_p0 = scmp.lt.s32.totalorder (%p254_p6), %s1223_s25, %s1219_s7 }
  0xbe   : >> { %v828_v31 = vadd.f32 %v827_v48, %v765_v50  ;;  %v865_v50 = vadd.s32 (%p254_p6), %v863_v49, %v1996_v11  ;;  %v1997_v48 = vld [vmem:[#allocation16_spill] sm:$0xff] (%p254_p6)  ;;  %vm868_vm0 = vcmp.lt.s32.totalorder (%p254_p6), %v864_v47, 2109 }
  0xbf   : > { %v866_v15 = vadd.s32 (%p254_p6), %v863_v49, %v1997_v48  ;;  %v872_v37 = vsel (%p254_p6), %vm868_vm0, %v853_v54, 0.0  ;;  %p1221_p11 = pnand (%p254_p6), %p1220_p8, %p1429_p1  ;;  %p1226_p4 = por (%p254_p6), %p1225_p0, %p1224_p13 }
  0xc0   : >> { %v829_v57 = vadd.f32 %v828_v31, %v766_v55  ;;  %v1998_v55 = vld [vmem:[#allocation17_spill] sm:$0xff] (%p254_p6)  ;;  %v854_v31 = vmul.f32 (%p254_p6), %v850_v44, %v850_v44  ;;  %vm869_vm1 = vcmp.lt.s32.totalorder (%p254_p6), %v865_v50, 2109 }
  0xc1   : > { %v867_v51 = vadd.s32 (%p254_p6), %v863_v49, %v1998_v55  ;;  %vm870_vm2 = vcmp.lt.s32.totalorder (%p254_p6), %v866_v15, 2109  ;;  %p1222_p12 = pneg (%p254_p6), %p1221_p11 }
  0xc2   : >> { %v830_v59 = vadd.f32 %v829_v57, %v767_v61  ;;  %v856_v61 = vmul.f32 (%p254_p6), %v852_v53, %v852_v53  ;;  %v873_v56 = vsel (%p254_p6), %vm869_vm1, %v854_v31, 0.0  ;;  %v874_v58 = vsel (%p254_p6), %vm870_vm2, %v855_v16, 0.0 }
  0xc3   : > { %vm871_vm3 = vcmp.lt.s32.totalorder (%p254_p6), %v867_v51, 2109  ;;  %v876_v57 = vadd.f32 (%p254_p6), %v873_v56, %v872_v37  ;;  %p1227_p5 = pnand (%p254_p6), %p1226_p4, %p1222_p12 }
  0xc4   : >> { %v831_v33 = vadd.f32 %v830_v59, %v768_v62  ;;  %v875_v17 = vsel (%p254_p6), %vm871_vm3, %v856_v61, 0.0 }
  0xc5   : > { %v877_v62 = vadd.f32 (%p254_p6), %v876_v57, %v874_v58 }
  0xc6   : >> { %v832_v0 = vadd.f32 %v831_v33, %v769_v63 }
  0xc7   : > { %v878_v32 = vadd.f32 (%p254_p6), %v877_v62, %v875_v17 }
  0xc8   : >> { %v833_v40 = vadd.f32 %v832_v0, %v770_v60 }
  0xca   : >> { %v834_v13 = vadd.f32 %v833_v40, %v771_v52 }
  0xcc   : >> { %v835_v41 = vadd.f32 %v834_v13, %v772_v14 }
  0xce   : >> { %v836_v20 = vadd.f32 %v835_v41, %v773_v19 }
  0xd0   : >> { %v837_v45 = vadd.f32 %v836_v20, %v774_v18 }
  0xd2   : >> { %v838_v26 = vadd.f32 %v837_v45, %v775_v5 }
  0xd4   : >> { %v839_v42 = vadd.f32 %v838_v26, %v776_v30  ;;  %256 = sbr.rel (!%p254_p6) target bundleno = 56 (0x38), region = 103 }
  0xd6   : >> { %v840_v27 = vadd.f32 %v1994_v46, %v839_v42  }
  0xd8   : >> { %v1995_v0 = vmov %v840_v27  ;;  %v879_v1 = vadd.f32 (%p254_p6), %v878_v32, %v840_v27 }
  0xda   : > { %885 = vst [vmem:[%s235_s19] sm:$0xff] %v879_v1 }
  0xdb   : > { %1230 = shalt.err (!%p1227_p5)
}
  0xdc   : > { %1037 = dma.vmem_to_hbm [thread:$0]  (%p1429_p1), %s900_s26, 128, %s902_s27, %s887_s15  }
  0xdd PF: > { %s913_s0 = sand.u32 1, %s1289_s9   ;;  %p1047_p7 = pnand %p1018_p2, %p1434_p3 }
  0xde   : > { %s914_s5 = scalar_lea.sflag [#allocation5], %s913_s0 }
  0xdf   : > { %p1048_p9 = pneg %p1047_p7 }
  0xe1   : > { %1284 = dma.done.wait (%p1048_p9), %s914_s5, 128  }
  0xe2   : > { %1286 = vsyncadd (%p1048_p9), %s914_s5, 4294967168  ;;  %s21_s17 = sadd.s32 1, %s1321_s17   ;;  %s1999_s15 = sld [smem:[#allocation12_spill]] }
  0xe3   : > { %p18_p10 = scmp.ge.s32.totalorder %s21_s17, 4   ;;  %s2000_s16 = sld [smem:[#allocation13_spill]] }
  0xe4   : > { %s2001_s9 = smov %s1293_s10  ;;  %s2002_s10 = smov %s1297_s11 }
  0xe5   : > { %s2003_s11 = smov %s1420_s29  ;;  %s2004_s12 = smov %s1305_s13 }
  0xe6   : > { %s2005_s13 = smov %s1309_s14  ;;  %s2006_s14 = smov %s1423_s30 }
  0xe7   :  { %20 = sbr.rel (!%p18_p10) target bundleno = 12 (0xc), region = 114 }
  0xec   :  { %920 = vsyncpa [#allocation4], 1 }
  0xed   :  { %922 = vsyncpa [#allocation4 + $0x1], 1 }
  0xee   :  { %923 = vsyncpa [#allocation7], 1 }
  0xef   :  { %925 = vsyncpa [#allocation7 + $0x1], 1 }
  0xf0   :  { %926 = vsyncpa [#allocation5], 1 }
  0xf1   :  { %928 = vsyncpa [#allocation5 + $0x1], 1 }

</bundles_post_ra>
